<compile_context>
chip_gen: v7x
topology: tpu7x:2x2x1
jax: 0.10.0
libtpu: 0.0.40
codegen_flags: <defaults>
</compile_context>

<pallas_src>
import jax
import jax.numpy as jnp
from jax.experimental import pallas as pl
from jax.experimental.pallas import tpu as pltpu


# ----------------------------------------------------------------------------
# Pallas kernel: element-wise clone (equivalent of torch.Tensor.clone()).
# ----------------------------------------------------------------------------
_LANES = 512                     # lane-dense output slab: multiple of 128
_TARGET_BLOCK_BYTES = 2 << 20    # ~2 MiB per block; 4x resident when dbl-buffered
_TINY_BYTES = 4096               # <= ~1 vreg of data: skip the kernel entirely
_VMEM_LIMIT_BYTES = 32 * 1024 * 1024   # safe on v5e/v6e (128 MiB) and v7x (64 MiB)


def _clone_kernel(x_ref, o_ref):
    o_ref[...] = x_ref[...]


def _ceil_div(a, b):
    return -(-a // b)


def _round_up(a, b):
    return _ceil_div(a, b) * b


def pallas_clone(x: jnp.ndarray) -> jnp.ndarray:
    """Materialize a copy of `x` through a lane-dense tiled Pallas TPU kernel."""
    x = jnp.asarray(x)
    orig_shape = x.shape
    dtype = x.dtype
    itemsize = jnp.dtype(dtype).itemsize
    n = int(x.size)

    # Tiny bookkeeping tensors: kernel-launch + DMA-setup overhead dwarfs the
    # copy.  JAX arrays are immutable, so returning the array IS a valid clone.
    if n == 0 or n * itemsize <= _TINY_BYTES:
        return x

    # Dtype-aware minimum sublane tile (sub-32-bit dtypes pack along sublanes).
    sub = {4: 8, 2: 16, 1: 32}.get(itemsize, 8)

    # Row tile targeting ~2 MiB blocks, rounded to the sublane multiple.
    target_rows = max(sub, (_TARGET_BLOCK_BYTES // (_LANES * itemsize)))
    target_rows = max(sub, (target_rows // sub) * sub)

    rows_needed = _ceil_div(n, _LANES)
    tile_rows = min(target_rows, _round_up(rows_needed, sub))
    # Prefer >= 2 grid steps when the data allows it (v7x: 2 TensorCores/chip).
    if _ceil_div(rows_needed, tile_rows) < 2 and rows_needed >= 2 * sub:
        tile_rows = max(sub, _round_up(_ceil_div(rows_needed, 2), sub))

    rows = _round_up(rows_needed, tile_rows)
    grid = (rows // tile_rows,)
    pad = rows * _LANES - n

    # Flatten to a lane-dense (rows, 512) slab; pad the tail (cheap for a copy).
    x_flat = x.reshape(-1)
    if pad:
        x_flat = jnp.pad(x_flat, (0, pad))
    x2 = x_flat.reshape(rows, _LANES)

    out2 = pl.pallas_call(
        _clone_kernel,
        out_shape=jax.ShapeDtypeStruct((rows, _LANES), dtype),
        grid_spec=pltpu.PrefetchScalarGridSpec(
            num_scalar_prefetch=0,
            grid=grid,
            in_specs=[pl.BlockSpec((tile_rows, _LANES), lambda i: (i, 0))],
            out_specs=pl.BlockSpec((tile_rows, _LANES), lambda i: (i, 0)),
        ),
        compiler_params=pltpu.CompilerParams(
            dimension_semantics=("parallel",),
            vmem_limit_bytes=_VMEM_LIMIT_BYTES,
        ),
    )(x2)

    out_flat = out2.reshape(-1)
    if pad:
        out_flat = out_flat[:n]
    return out_flat.reshape(orig_shape)


def _clone_detach(value):
    """torch's value.clone().detach() -> Pallas copy + stop_gradient."""
    return jax.lax.stop_gradient(pallas_clone(value))


# ----------------------------------------------------------------------------
# Python-side port of the bookkeeping class hierarchy.
# ----------------------------------------------------------------------------
def object_is_basemodel(cls):
    for bc in cls.__bases__:
        if bc.__name__ in ['Module', 'BaseModelFSL', 'object', 'type']:
            return bc.__name__ == 'BaseModelFSL'
        return object_is_basemodel(bc)
    return False


class Module:
    """Minimal stand-in for torch.nn.Module's child tracking."""

    def __init__(self):
        object.__setattr__(self, '_children', {})

    def __setattr__(self, name, value):
        if isinstance(value, Module):
            self._children[name] = value
        object.__setattr__(self, name, value)

    def named_children(self):
        return list(self._children.items())

    def __call__(self, *args, **kwargs):
        return self.forward(*args, **kwargs)


class BaseModelFSL(Module):

    def __init__(self):
        super().__init__()
        self.exp_indices = {}
        self.output = {}

    def set_meter(self, name, value):
        self.exp_indices[name] = value

    def register_output(self, name, value):
        self.output[name] = value

    def get_meter(self, name):
        if name not in self.exp_indices:
            raise KeyError("No such meter: '{}' in the meter set".format(name))
        return self.exp_indices[name]

    def set_output(self, name, value):
        self.output[name] = value
        # clone().detach() -> Pallas copy kernel + stop_gradient
        self.exp_indices[name] = _clone_detach(value)

    def register_sub_modules(self):
        submodules = [name for name, _ in self.named_children()]
        for submodl_name in submodules:
            submodl = getattr(self, submodl_name)
            if (submodl.__class__.__name__ != 'function'
                    and object_is_basemodel(submodl.__class__)
                    and submodl.exp_indices):
                meter_names = [k for k in submodl.exp_indices]
                output_names = [k for k in submodl.output]
                for meter_n in meter_names:
                    self.set_meter(meter_n, submodl.exp_indices.pop(meter_n))
                for output_n in output_names:
                    self.set_output(output_n, submodl.output.pop(output_n))

    def forward(self, *args, **kwargs):
        self.exp_indices = {}
        outp_put = self.forward_(*args, **kwargs)
        outputs = {on: self.output[on] for on in self.output if on not in outp_put}
        self.register_sub_modules()
        return {**outp_put, **outputs}

    def forward_(self, *args, **kwargs):
        raise NotImplementedError


# ----------------------------------------------------------------------------
# Demo subclasses (only to exercise the base-class forward semantics).
# ----------------------------------------------------------------------------
class _DemoChild(BaseModelFSL):
    def __init__(self):
        super().__init__()

    def forward_(self, x):
        y = pallas_clone(x)                      # identity pass through kernel
        self.set_output('child_feat', y)         # goes through Pallas clone
        self.set_meter('child_meter', jnp.float32(1.0))
        return {'child_out': y}


class _DemoParent(BaseModelFSL):
    def __init__(self):
        super().__init__()
        self.child = _DemoChild()

    def forward_(self, x):
        c = self.child(x)
        y = pallas_clone(c['child_out'])
        self.register_output('parent_aux', y)    # not in returned dict -> merged
        return {'out': y}


if __name__ == "__main__":
    key = jax.random.PRNGKey(0)
    x = jax.random.normal(key, (2, 4, 16, 16), dtype=jnp.float32)  # NCHW

    model = _DemoParent()
    out = model(x)

    # Block on everything produced.
    for v in out.values():
        jax.block_until_ready(v)
    for v in model.exp_indices.values():
        jax.block_until_ready(v)

    # Sanity: clone kernel reproduces the input exactly.
    assert out['out'].shape == x.shape
    assert bool(jnp.allclose(out['out'], x))
    assert bool(jnp.allclose(out['parent_aux'], x))
    # Sub-module meters/outputs hoisted into parent by register_sub_modules.
    assert 'child_meter' in model.exp_indices
    assert 'child_feat' in model.output
    assert bool(jnp.allclose(model.exp_indices['child_feat'], x))

    # Also exercise a larger, multi-grid-step clone (bf16, dtype-aware tiles).
    big = jax.random.normal(jax.random.PRNGKey(1), (64, 4, 32, 33),
                            dtype=jnp.bfloat16)
    big_copy = pallas_clone(big)
    jax.block_until_ready(big_copy)
    assert bool(jnp.all(big_copy == big))

    print("KERNEL_OK")
</pallas_src>

<mosaic_0001>
module attributes {stable_mosaic.version = 11 : i64} {
  func.func @_clone_kernel(%arg0: i32, %arg1: memref<8x512xf32, #tpu.memory_space<vmem>>, %arg2: memref<8x512xf32, #tpu.memory_space<vmem>>) attributes {dimension_semantics = [#tpu.dimension_semantics<parallel>], iteration_bounds = array<i64: 1>, scalar_prefetch = 0 : i64, scratch_operands = 0 : i64, tpu.core_type = #tpu.core_type<tc>, window_params = [{transform_indices = @transform_0, window_bounds = array<i64: 8, 512>}, {transform_indices = @transform_1, window_bounds = array<i64: 8, 512>}]} {
    %c0 = arith.constant 0 : index
    %c0_0 = arith.constant 0 : index
    %0 = vector.load %arg1[%c0, %c0_0] : memref<8x512xf32, #tpu.memory_space<vmem>>, vector<8x512xf32>
    %c0_1 = arith.constant 0 : index
    %c0_2 = arith.constant 0 : index
    %1 = vector.load %arg2[%c0_1, %c0_2] : memref<8x512xf32, #tpu.memory_space<vmem>>, vector<8x512xf32>
    tpu.vector_store %arg2[%c0_1, %c0_2], %0 {strides = array<i32>} : memref<8x512xf32, #tpu.memory_space<vmem>>, vector<8x512xf32>,
    return
  }
  func.func @transform_0(%arg0: i32) -> (i32, i32) {
    %c0_i32 = arith.constant 0 : i32
    %c0_i32_0 = arith.constant 0 : i32
    return %arg0, %c0_i32 : i32, i32
  }
  func.func @transform_1(%arg0: i32) -> (i32, i32) {
    %c0_i32 = arith.constant 0 : i32
    %c0_i32_0 = arith.constant 0 : i32
    return %arg0, %c0_i32 : i32, i32
  }
}

</mosaic_0001>

<bundles_post_ra>
// kernel: tpu_custom_call.1
= control target key start
LH: loop header
LB: loop body
LE: loop exit
PB: predicated region body
PF: predicated region fallthrough
CT: control target
= control target key end

     0   :  { %6 = vsyncpa [#allocation3], 0  ;;  %s130_s0 = inlined_call_operand.hbm [shape: f32[8,512], index: 0, kind: input, shape index: {}]   ;;  %s131_s1 = inlined_call_operand.hbm [shape: f32[8,512], index: 1, kind: output, shape index: {}]  }
   0x1   :  { %7 = vsyncpa [#allocation4], 0  ;;  %s94_s6 = smov [#allocation2]   ;;  %s46_s10 = scalar_lea.hbm %s130_s0, 512 }
   0x2   :  { %s14_s7 = sshll.u32 %s94_s6, 4  ;;  %p47_p0 = scmp.ne.s32.totalorder %s130_s0, %s46_s10  ;;  %s15_s7 = int_to_ptr.vmem [resolvable:$true] %s14_s7 }
   0x3   :  { %p50_p1 = scmp.lt.u32.totalorder %s46_s10, %s130_s0 }
   0x5   :  { %p52_p2 = pnand %p50_p1, %p47_p0 }
   0x7   :  { %55 = shalt.err (!%p52_p2)
}
   0x8   :  { %s56_s15 = scalar_lea.vmem %s15_s7, 512  ;;  %p61_p4 = scmp.lt.s32.totalorder %s15_s7, %s15_s7 }
   0x9   :  { %p57_p3 = scmp.ne.s32.totalorder %s15_s7, %s56_s15  ;;  %p62_p5 = scmp.lt.s32.totalorder %s56_s15, %s56_s15 }
   0xb   :  { %p63_p6 = por %p62_p5, %p61_p4 }
   0xd   :  { %p64_p7 = pnand %p63_p6, %p57_p3 }
   0xf   :  { %67 = shalt.err (!%p64_p7)
}
  0x10   :  { %17 = dma.hbm_to_vmem [thread:$0]  %s130_s0, 512, %s15_s7, [#allocation3]  }
  0x11   :  { %90 = dma.done.wait [#allocation3], 512  }
  0x12   :  { %91 = vsyncadd [#allocation3], 4294966784  ;;  %s95_s18 = smov [#allocation5]   ;;  %v21_v0 = vld [vmem:[#allocation2] sm:$0xff]  ;;  %v22_v1 = vld [vmem:[#allocation2 + $0x8] sm:$0xff] }
  0x13   :  { %s35_s19 = sshll.u32 %s95_s18, 4  ;;  %v23_v2 = vld [vmem:[#allocation2 + $0x10] sm:$0xff]  ;;  %25 = vst [vmem:[#allocation5] sm:$0xff] %v21_v0  ;;  %26 = vst [vmem:[#allocation5 + $0x8] sm:$0xff] %v22_v1  ;;  %v24_v3 = vld [vmem:[#allocation2 + $0x18] sm:$0xff]  ;;  %s36_s19 = int_to_ptr.vmem [resolvable:$true] %s35_s19 }
  0x14   :  { %27 = vst [vmem:[#allocation5 + $0x10] sm:$0xff] %v23_v2  ;;  %28 = vst [vmem:[#allocation5 + $0x18] sm:$0xff] %v24_v3  ;;  %s68_s20 = scalar_lea.vmem %s36_s19, 512  ;;  %p73_p9 = scmp.lt.s32.totalorder %s36_s19, %s36_s19 }
  0x15   :  { %p69_p8 = scmp.ne.s32.totalorder %s36_s19, %s68_s20  ;;  %p74_p10 = scmp.lt.s32.totalorder %s68_s20, %s68_s20 }
  0x17   :  { %p75_p11 = por %p74_p10, %p73_p9 }
  0x19   :  { %p76_p12 = pnand %p75_p11, %p69_p8 }
  0x1b   :  { %79 = shalt.err (!%p76_p12)
}
  0x1c   :  { %s80_s22 = scalar_lea.hbm %s131_s1, 512 }
  0x1d   :  { %p81_p13 = scmp.ne.s32.totalorder %s131_s1, %s80_s22  ;;  %p84_p0 = scmp.lt.u32.totalorder %s80_s22, %s131_s1 }
  0x1f   :  { %p86_p1 = pnand %p84_p0, %p81_p13 }
  0x21   :  { %89 = shalt.err (!%p86_p1)
}
  0x22   :  { %38 = dma.vmem_to_hbm [thread:$0]  %s36_s19, 512, %s131_s1, [#allocation4]  }
  0x23   :  { %92 = dma.done.wait [#allocation4], 512  }
  0x24   :  { %93 = vsyncadd [#allocation4], 4294966784 }
  0x25   :  { %42 = vsyncpa [#allocation3], 1 }
  0x26   :  { %43 = vsyncpa [#allocation4], 1 }

</bundles_post_ra>
